<compile_context>
chip_gen: v7x
topology: tpu7x:2x2x1
jax: 0.10.0
libtpu: 0.0.40
codegen_flags: <defaults>
</compile_context>

<pallas_src>
import functools
import math

import jax
import jax.numpy as jnp
from jax.experimental import pallas as pl
from jax.experimental.pallas import tpu as pltpu


_VMEM_LIMIT = 48 * 1024 * 1024   # safe under v7x's 64 MiB VMEM, ample on v5e/v6e


def _pick_tm():
    """512-row tiles on 128 MiB-VMEM chips (v5e/v6e), 256 on v7x / unknown."""
    try:
        info = pltpu.get_tpu_info()
        vmem = int(getattr(info, "vmem_capacity_bytes", 0) or 0)
        if vmem >= (96 << 20):
            return 512
    except Exception:
        pass
    return 256


_TM = _pick_tm()


def _tile(dim, preferred, granule):
    """Largest tile <= preferred that divides dim and respects the TPU granule
    (8 sublanes / 128 lanes); falls back to the full dim for small shapes."""
    if dim <= preferred:
        return dim
    t = (preferred // granule) * granule
    while t >= granule:
        if dim % t == 0:
            return t
        t -= granule
    return dim


# ----------------------------------------------------------------------------
# dense: single-contraction matmul (K whole) with fused bias + activation
# ----------------------------------------------------------------------------
def _dense_act_kernel(x_ref, w_ref, b_ref, o_ref, *, activation):
    y = jnp.dot(x_ref[...], w_ref[...],
                preferred_element_type=jnp.float32) + b_ref[...]
    if activation == "relu":
        y = jnp.maximum(y, 0.0)
    elif activation == "gelu":
        # exact (erf-based) GELU, matching HF's GELUActivation
        y = 0.5 * y * (1.0 + jax.lax.erf(y * (1.0 / math.sqrt(2.0))))
    o_ref[...] = y.astype(o_ref.dtype)


def dense_act(x, w, b, activation=None, *, tm=None, tn=512):
    """o = act(x @ w + b); x:(M,K) bf16, w:(K,N) bf16, b:(N,) f32 -> (M,N) bf16.

    K is kept whole (fits VMEM for DistilBERT's 768/3072), so the grid is 2-D
    and no accumulator scratch / init-finalize phases are needed.
    """
    M, K = x.shape
    N = w.shape[1]
    tm = _tile(M, tm or _TM, 8)
    tn = _tile(N, tn, 128)
    kernel = functools.partial(_dense_act_kernel, activation=activation)
    return pl.pallas_call(
        kernel,
        out_shape=jax.ShapeDtypeStruct((M, N), jnp.bfloat16),
        grid=(M // tm, N // tn),
        in_specs=[
            pl.BlockSpec((tm, K), lambda i, j: (i, 0)),
            pl.BlockSpec((K, tn), lambda i, j: (0, j)),
            pl.BlockSpec((1, tn), lambda i, j: (0, j)),
        ],
        out_specs=pl.BlockSpec((tm, tn), lambda i, j: (i, j)),
        compiler_params=pltpu.CompilerParams(
            dimension_semantics=("parallel", "parallel"),
            vmem_limit_bytes=_VMEM_LIMIT),
    )(x, w, b.reshape(1, N))


# ----------------------------------------------------------------------------
# dense with fused bias + residual-add + LayerNorm epilogue (K and N whole)
# ----------------------------------------------------------------------------
def _dense_ln_kernel(x_ref, w_ref, b_ref, res_ref, g_ref, bb_ref, o_ref):
    y = (jnp.dot(x_ref[...], w_ref[...], preferred_element_type=jnp.float32)
         + b_ref[...] + res_ref[...].astype(jnp.float32))
    mu = jnp.mean(y, axis=-1, keepdims=True)
    var = jnp.mean((y - mu) ** 2, axis=-1, keepdims=True)
    o_ref[...] = ((y - mu) * jax.lax.rsqrt(var + 1e-12) * g_ref[...]
                  + bb_ref[...]).astype(o_ref.dtype)


def dense_ln(x, w, b, residual, gamma, beta, *, tm=None):
    """o = LayerNorm(x @ w + b + residual), eps=1e-12 (DistilBERT). bf16 I/O."""
    M, K = x.shape
    N = w.shape[1]
    tm = _tile(M, tm or _TM, 8)
    return pl.pallas_call(
        _dense_ln_kernel,
        out_shape=jax.ShapeDtypeStruct((M, N), jnp.bfloat16),
        grid=(M // tm,),
        in_specs=[
            pl.BlockSpec((tm, K), lambda i: (i, 0)),
            pl.BlockSpec((K, N), lambda i: (0, 0)),
            pl.BlockSpec((1, N), lambda i: (0, 0)),
            pl.BlockSpec((tm, N), lambda i: (i, 0)),
            pl.BlockSpec((1, N), lambda i: (0, 0)),
            pl.BlockSpec((1, N), lambda i: (0, 0)),
        ],
        out_specs=pl.BlockSpec((tm, N), lambda i: (i, 0)),
        compiler_params=pltpu.CompilerParams(
            dimension_semantics=("parallel",),
            vmem_limit_bytes=_VMEM_LIMIT),
    )(x, w, b.reshape(1, N), residual, gamma.reshape(1, N), beta.reshape(1, N))


# ----------------------------------------------------------------------------
# embedding add + LayerNorm fused (word-emb + pos-emb summed in-kernel)
# ----------------------------------------------------------------------------
def _emb_ln_kernel(we_ref, pe_ref, g_ref, b_ref, o_ref):
    x = we_ref[0].astype(jnp.float32) + pe_ref[...].astype(jnp.float32)
    mu = jnp.mean(x, axis=-1, keepdims=True)
    var = jnp.mean((x - mu) ** 2, axis=-1, keepdims=True)
    y = (x - mu) * jax.lax.rsqrt(var + 1e-12) * g_ref[...] + b_ref[...]
    o_ref[0] = y.astype(o_ref.dtype)


def emb_layernorm(we, pe, gamma, beta, *, ts=256):
    """we:(B,S,D) bf16, pe:(S,D) bf16 -> LayerNorm(we+pe) (B,S,D) bf16."""
    B, S, D = we.shape
    ts = _tile(S, ts, 8)
    return pl.pallas_call(
        _emb_ln_kernel,
        out_shape=jax.ShapeDtypeStruct((B, S, D), jnp.bfloat16),
        grid=(B, S // ts),
        in_specs=[
            pl.BlockSpec((1, ts, D), lambda b, s: (b, s, 0)),
            pl.BlockSpec((ts, D), lambda b, s: (s, 0)),
            pl.BlockSpec((1, D), lambda b, s: (0, 0)),
            pl.BlockSpec((1, D), lambda b, s: (0, 0)),
        ],
        out_specs=pl.BlockSpec((1, ts, D), lambda b, s: (b, s, 0)),
        compiler_params=pltpu.CompilerParams(
            dimension_semantics=("parallel", "parallel"),
            vmem_limit_bytes=_VMEM_LIMIT),
    )(we, pe, gamma.reshape(1, D), beta.reshape(1, D))


# ----------------------------------------------------------------------------
# attention: one (batch, head) per grid step, head-major layout (no in-kernel
# lane slicing / concat); scores in fp32, EUP reciprocal for the softmax denom
# ----------------------------------------------------------------------------
def _attn_kernel(q_ref, k_ref, v_ref, m_ref, o_ref, *, scale):
    q = q_ref[0, 0]                                   # (S, Dh) bf16
    k = k_ref[0, 0]
    v = v_ref[0, 0]
    mask = m_ref[...]                                 # (1, S) — 1 keep / 0 pad
    # contract on the last dims -> no explicit k.T / XLU transpose
    s = jax.lax.dot_general(q, k, (((1,), (1,)), ((), ())),
                            preferred_element_type=jnp.float32) * scale
    s = jnp.where(mask > 0.5, s, jnp.finfo(jnp.float32).min)
    s = s - jnp.max(s, axis=-1, keepdims=True)
    p = jnp.exp(s)
    p = p * pl.reciprocal(jnp.sum(p, axis=-1, keepdims=True), approx=True)
    o_ref[0, 0] = jnp.dot(p.astype(jnp.bfloat16), v,
                          preferred_element_type=jnp.float32).astype(o_ref.dtype)
    # TODO(synk): for long S (>=1024) switch to flash-style key tiling (grid
    # (B, H, S//tq) with online softmax) instead of the full SxS score matrix.


def attention(q, k, v, mask):
    """q/k/v: (B, H, S, Dh) bf16; mask: (B, S) f32 -> (B, H, S, Dh) bf16."""
    B, H, S, Dh = q.shape
    kernel = functools.partial(_attn_kernel, scale=1.0 / math.sqrt(Dh))
    return pl.pallas_call(
        kernel,
        out_shape=jax.ShapeDtypeStruct((B, H, S, Dh), jnp.bfloat16),
        grid=(B, H),
        in_specs=[
            pl.BlockSpec((1, 1, S, Dh), lambda b, h: (b, h, 0, 0)),
            pl.BlockSpec((1, 1, S, Dh), lambda b, h: (b, h, 0, 0)),
            pl.BlockSpec((1, 1, S, Dh), lambda b, h: (b, h, 0, 0)),
            pl.BlockSpec((1, S), lambda b, h: (b, 0)),
        ],
        out_specs=pl.BlockSpec((1, 1, S, Dh), lambda b, h: (b, h, 0, 0)),
        compiler_params=pltpu.CompilerParams(
            dimension_semantics=("parallel", "parallel"),
            vmem_limit_bytes=_VMEM_LIMIT),
    )(q, k, v, mask)


# ----------------------------------------------------------------------------
# fused classification tail: pre_classifier + ReLU + classifier + masked
# log-softmax + CrossEntropy mean, all in one kernel (one launch, no HBM
# round-trips for pooled/logits)
# ----------------------------------------------------------------------------
def _cls_head_kernel(cls_ref, pre_w_ref, pre_b_ref, cls_w_ref, cls_b_ref,
                     lab_ref, o_ref, *, n_valid):
    pooled = jnp.dot(cls_ref[...], pre_w_ref[...],
                     preferred_element_type=jnp.float32) + pre_b_ref[...]
    pooled = jnp.maximum(pooled, 0.0)
    logits = jnp.dot(pooled.astype(jnp.bfloat16), cls_w_ref[...],
                     preferred_element_type=jnp.float32) + cls_b_ref[...]
    B, C = logits.shape
    col = jax.lax.broadcasted_iota(jnp.int32, (B, C), 1)
    xm = jnp.where(col < n_valid, logits, jnp.finfo(jnp.float32).min)
    m = jnp.max(xm, axis=-1, keepdims=True)
    lse = m + jnp.log(jnp.sum(jnp.exp(xm - m), axis=-1, keepdims=True))
    lab = lab_ref[...]                                 # (B, 1) int32
    picked = jnp.sum(jnp.where(col == lab, logits, 0.0), axis=-1, keepdims=True)
    o_ref[0, 0] = jnp.mean(lse - picked)


def classification_head_loss(cls, pre_w, pre_b, cls_w, cls_b, labels, n_labels):
    B, D = cls.shape
    C = cls_w.shape[1]
    out = pl.pallas_call(
        functools.partial(_cls_head_kernel, n_valid=n_labels),
        out_shape=jax.ShapeDtypeStruct((1, 1), jnp.float32),
        grid=(1,),
        in_specs=[
            pl.BlockSpec((B, D), lambda i: (0, 0)),
            pl.BlockSpec((D, D), lambda i: (0, 0)),
            pl.BlockSpec((1, D), lambda i: (0, 0)),
            pl.BlockSpec((D, C), lambda i: (0, 0)),
            pl.BlockSpec((1, C), lambda i: (0, 0)),
            pl.BlockSpec((B, 1), lambda i: (0, 0)),
        ],
        out_specs=pl.BlockSpec((1, 1), lambda i: (0, 0)),
        compiler_params=pltpu.CompilerParams(
            dimension_semantics=("arbitrary",),
            vmem_limit_bytes=_VMEM_LIMIT),
    )(cls, pre_w, pre_b.reshape(1, D), cls_w, cls_b.reshape(1, C),
      labels.reshape(B, 1).astype(jnp.int32))
    return out[0, 0]


# ----------------------------------------------------------------------------
# Model (DistilBERT-for-sequence-classification forward, scaled-down config)
# ----------------------------------------------------------------------------
def init_params(key, *, vocab, max_pos, dim, n_heads, ffn_dim, n_layers,
                n_labels, label_pad=128):
    # TODO(synk): pretrained 'distilbert-base-uncased' weights are not loadable
    # in-script; random init is used with the same parameter structure.
    def nrm(k, shape, scale=0.02):
        return scale * jax.random.normal(k, shape, dtype=jnp.float32)

    c_pad = max(label_pad, n_labels)
    keys = jax.random.split(key, 4 + n_layers)
    cls_w = jnp.zeros((dim, c_pad), jnp.float32).at[:, :n_labels].set(
        nrm(keys[3], (dim, n_labels)))
    params = {
        "word_emb": nrm(keys[0], (vocab, dim)).astype(jnp.bfloat16),
        "pos_emb": nrm(keys[1], (max_pos, dim)).astype(jnp.bfloat16),
        "emb_ln_g": jnp.ones((dim,), jnp.float32),
        "emb_ln_b": jnp.zeros((dim,), jnp.float32),
        "pre_w": nrm(keys[2], (dim, dim)).astype(jnp.bfloat16),
        "pre_b": jnp.zeros((dim,), jnp.float32),
        "cls_w": cls_w.astype(jnp.bfloat16),          # lane-padded to 128
        "cls_b": jnp.zeros((c_pad,), jnp.float32),
        "layers": [],
    }
    for li in range(n_layers):
        lk = jax.random.split(keys[4 + li], 6)
        qkv_w = jnp.concatenate([nrm(lk[0], (dim, dim)),
                                 nrm(lk[1], (dim, dim)),
                                 nrm(lk[2], (dim, dim))], axis=1)
        params["layers"].append({
            "qkv_w": qkv_w.astype(jnp.bfloat16),      # fused Q|K|V projection
            "qkv_b": jnp.zeros((3 * dim,), jnp.float32),
            "o_w": nrm(lk[3], (dim, dim)).astype(jnp.bfloat16),
            "o_b": jnp.zeros((dim,), jnp.float32),
            "sa_ln_g": jnp.ones((dim,), jnp.float32),
            "sa_ln_b": jnp.zeros((dim,), jnp.float32),
            "lin1_w": nrm(lk[4], (dim, ffn_dim)).astype(jnp.bfloat16),
            "lin1_b": jnp.zeros((ffn_dim,), jnp.float32),
            "lin2_w": nrm(lk[5], (ffn_dim, dim)).astype(jnp.bfloat16),
            "lin2_b": jnp.zeros((dim,), jnp.float32),
            "out_ln_g": jnp.ones((dim,), jnp.float32),
            "out_ln_b": jnp.zeros((dim,), jnp.float32),
        })
    return params


def classification_model_forward(params, input_ids, attention_mask, labels,
                                 *, n_heads, n_labels):
    """Returns outputs.loss (scalar), matching ClassificationModel.forward."""
    B, S = input_ids.shape
    D = params["word_emb"].shape[1]
    Dh = D // n_heads

    # --- embeddings: gather in JAX glue, add + LayerNorm fused in Pallas ---
    we = jnp.take(params["word_emb"], input_ids, axis=0)          # (B,S,D) bf16
    pe = params["pos_emb"][:S]                                    # (S,D)  bf16
    h = emb_layernorm(we, pe, params["emb_ln_g"], params["emb_ln_b"])
    h = h.reshape(B * S, D)                                       # bf16 view
    # TODO(synk): dropout omitted (deterministic / eval-mode forward).

    mask_f = attention_mask.astype(jnp.float32)                   # (B,S)

    for layer in params["layers"]:
        # fused QKV projection: one pallas_call, h read from HBM once
        qkv = dense_act(h, layer["qkv_w"], layer["qkv_b"])        # (B*S, 3D) bf16
        # head split via one amortized XLA transpose (no in-kernel lane slicing)
        qkv_t = jnp.transpose(qkv.reshape(B, S, 3, n_heads, Dh),
                              (2, 0, 3, 1, 4))                    # (3,B,H,S,Dh)
        ctx = attention(qkv_t[0], qkv_t[1], qkv_t[2], mask_f)     # (B,H,S,Dh)
        ctx = jnp.transpose(ctx, (0, 2, 1, 3)).reshape(B * S, D)  # merge heads
        # output projection with fused bias + residual + LayerNorm epilogue
        h = dense_ln(ctx, layer["o_w"], layer["o_b"],
                     h, layer["sa_ln_g"], layer["sa_ln_b"])
        # FFN: lin1+GELU fused, lin2 with fused residual + LayerNorm epilogue
        f = dense_act(h, layer["lin1_w"], layer["lin1_b"], activation="gelu")
        h = dense_ln(f, layer["lin2_w"], layer["lin2_b"],
                     h, layer["out_ln_g"], layer["out_ln_b"])

    # --- fused classification head + CrossEntropyLoss (mean over batch) ---
    cls = h.reshape(B, S, D)[:, 0]                                # (B,D) [CLS]
    return classification_head_loss(cls, params["pre_w"], params["pre_b"],
                                    params["cls_w"], params["cls_b"],
                                    labels, n_labels)


# ----------------------------------------------------------------------------
if __name__ == "__main__":
    # small config consistent with the module's forward
    VOCAB, MAX_POS = 100, 16
    DIM, HEADS, FFN, LAYERS = 32, 4, 64, 2
    N_LABELS = 5
    B, S = 2, 8

    key = jax.random.PRNGKey(0)
    kp, kid, klab = jax.random.split(key, 3)

    params = init_params(kp, vocab=VOCAB, max_pos=MAX_POS, dim=DIM,
                         n_heads=HEADS, ffn_dim=FFN, n_layers=LAYERS,
                         n_labels=N_LABELS)

    input_ids = jax.random.randint(kid, (B, S), 0, VOCAB, dtype=jnp.int32)
    attention_mask = jnp.ones((B, S), dtype=jnp.int32).at[1, 6:].set(0)  # pad tail
    labels = jax.random.randint(klab, (B,), 0, N_LABELS, dtype=jnp.int32)

    loss = classification_model_forward(params, input_ids, attention_mask, labels,
                                        n_heads=HEADS, n_labels=N_LABELS)
    loss = jax.block_until_ready(loss)
    assert loss.shape == () and jnp.isfinite(loss)
    print("KERNEL_OK")
</pallas_src>

<mosaic_0001>
module attributes {stable_mosaic.version = 11 : i64} {
  func.func @_emb_ln_kernel(%arg0: i32, %arg1: i32, %arg2: memref<1x8x32xbf16, #tpu.memory_space<vmem>>, %arg3: memref<8x32xbf16, #tpu.memory_space<vmem>>, %arg4: memref<1x32xf32, #tpu.memory_space<vmem>>, %arg5: memref<1x32xf32, #tpu.memory_space<vmem>>, %arg6: memref<1x8x32xbf16, #tpu.memory_space<vmem>>) attributes {dimension_semantics = [#tpu.dimension_semantics<parallel>, #tpu.dimension_semantics<parallel>], iteration_bounds = array<i64: 2, 1>, scalar_prefetch = 0 : i64, scratch_operands = 0 : i64, tpu.core_type = #tpu.core_type<tc>, window_params = [{transform_indices = @transform_0, window_bounds = array<i64: 1, 8, 32>}, {transform_indices = @transform_1, window_bounds = array<i64: 8, 32>}, {pipeline_mode = #tpu.pipeline_mode<synchronous>, transform_indices = @transform_2, window_bounds = array<i64: 1, 32>}, {pipeline_mode = #tpu.pipeline_mode<synchronous>, transform_indices = @transform_3, window_bounds = array<i64: 1, 32>}, {transform_indices = @transform_4, window_bounds = array<i64: 1, 8, 32>}]} {
    %c0 = arith.constant 0 : index
    %c0_0 = arith.constant 0 : index
    %c0_1 = arith.constant 0 : index
    %0 = vector.load %arg2[%c0, %c0_0, %c0_1] : memref<1x8x32xbf16, #tpu.memory_space<vmem>>, vector<1x8x32xbf16>
    %1 = vector.shape_cast %0 : vector<1x8x32xbf16> to vector<8x32xbf16>
    %2 = arith.extf %1 : vector<8x32xbf16> to vector<8x32xf32>
    %c0_2 = arith.constant 0 : index
    %c0_3 = arith.constant 0 : index
    %3 = vector.load %arg3[%c0_2, %c0_3] : memref<8x32xbf16, #tpu.memory_space<vmem>>, vector<8x32xbf16>
    %4 = arith.extf %3 : vector<8x32xbf16> to vector<8x32xf32>
    %5 = arith.addf %2, %4 : vector<8x32xf32>
    %cst = arith.constant dense<0.000000e+00> : vector<8xf32>
    %6 = vector.multi_reduction <add>, %5, %cst [1] : vector<8x32xf32> to vector<8xf32>
    %7 = vector.shape_cast %6 : vector<8xf32> to vector<8x1xf32>
    %cst_4 = arith.constant 3.200000e+01 : f32
    %8 = vector.broadcast %cst_4 : f32 to vector<8x1xf32>
    %9 = arith.divf %7, %8 : vector<8x1xf32>
    %10 = vector.broadcast %9 : vector<8x1xf32> to vector<8x32xf32>
    %11 = arith.subf %5, %10 : vector<8x32xf32>
    %12 = arith.mulf %11, %11 : vector<8x32xf32>
    %cst_5 = arith.constant dense<0.000000e+00> : vector<8xf32>
    %13 = vector.multi_reduction <add>, %12, %cst_5 [1] : vector<8x32xf32> to vector<8xf32>
    %14 = vector.shape_cast %13 : vector<8xf32> to vector<8x1xf32>
    %cst_6 = arith.constant 3.200000e+01 : f32
    %15 = vector.broadcast %cst_6 : f32 to vector<8x1xf32>
    %16 = arith.divf %14, %15 : vector<8x1xf32>
    %17 = vector.broadcast %9 : vector<8x1xf32> to vector<8x32xf32>
    %18 = arith.subf %5, %17 : vector<8x32xf32>
    %cst_7 = arith.constant 9.99999996E-13 : f32
    %19 = vector.broadcast %cst_7 : f32 to vector<8x1xf32>
    %20 = arith.addf %16, %19 : vector<8x1xf32>
    %21 = math.rsqrt %20 : vector<8x1xf32>
    %22 = vector.broadcast %21 : vector<8x1xf32> to vector<8x32xf32>
    %23 = arith.mulf %18, %22 : vector<8x32xf32>
    %c0_8 = arith.constant 0 : index
    %c0_9 = arith.constant 0 : index
    %24 = vector.load %arg4[%c0_8, %c0_9] : memref<1x32xf32, #tpu.memory_space<vmem>>, vector<1x32xf32>
    %25 = vector.broadcast %24 : vector<1x32xf32> to vector<8x32xf32>
    %26 = arith.mulf %23, %25 : vector<8x32xf32>
    %c0_10 = arith.constant 0 : index
    %c0_11 = arith.constant 0 : index
    %27 = vector.load %arg5[%c0_10, %c0_11] : memref<1x32xf32, #tpu.memory_space<vmem>>, vector<1x32xf32>
    %28 = vector.broadcast %27 : vector<1x32xf32> to vector<8x32xf32>
    %29 = arith.addf %26, %28 : vector<8x32xf32>
    %30 = arith.truncf %29 : vector<8x32xf32> to vector<8x32xbf16>
    %c0_12 = arith.constant 0 : index
    %c0_13 = arith.constant 0 : index
    %c0_14 = arith.constant 0 : index
    %31 = vector.load %arg6[%c0_12, %c0_13, %c0_14] : memref<1x8x32xbf16, #tpu.memory_space<vmem>>, vector<1x8x32xbf16>
    %32 = vector.shape_cast %31 : vector<1x8x32xbf16> to vector<8x32xbf16>
    %33 = vector.shape_cast %30 : vector<8x32xbf16> to vector<1x8x32xbf16>
    tpu.vector_store %arg6[%c0_12, %c0_13, %c0_14], %33 {strides = array<i32>} : memref<1x8x32xbf16, #tpu.memory_space<vmem>>, vector<1x8x32xbf16>,
    return
  }
  func.func @transform_0(%arg0: i32, %arg1: i32) -> (i32, i32, i32) {
    %c0_i32 = arith.constant 0 : i32
    %c0_i32_0 = arith.constant 0 : i32
    return %arg0, %arg1, %c0_i32 : i32, i32, i32
  }
  func.func @transform_1(%arg0: i32, %arg1: i32) -> (i32, i32) {
    %c0_i32 = arith.constant 0 : i32
    %c0_i32_0 = arith.constant 0 : i32
    return %arg1, %c0_i32 : i32, i32
  }
  func.func @transform_2(%arg0: i32, %arg1: i32) -> (i32, i32) {
    %c0_i32 = arith.constant 0 : i32
    %c0_i32_0 = arith.constant 0 : i32
    %c0_i32_1 = arith.constant 0 : i32
    return %c0_i32, %c0_i32_0 : i32, i32
  }
  func.func @transform_3(%arg0: i32, %arg1: i32) -> (i32, i32) {
    %c0_i32 = arith.constant 0 : i32
    %c0_i32_0 = arith.constant 0 : i32
    %c0_i32_1 = arith.constant 0 : i32
    return %c0_i32, %c0_i32_0 : i32, i32
  }
  func.func @transform_4(%arg0: i32, %arg1: i32) -> (i32, i32, i32) {
    %c0_i32 = arith.constant 0 : i32
    %c0_i32_0 = arith.constant 0 : i32
    return %arg0, %arg1, %c0_i32 : i32, i32, i32
  }
}

</mosaic_0001>

<bundles_post_ra>
// kernel: tpu_custom_call.1
= control target key start
LH: loop header
LB: loop body
LE: loop exit
PB: predicated region body
PF: predicated region fallthrough
CT: control target
= control target key end

     0   :  { %9 = vsyncpa [#allocation3], 0  ;;  %s888_s0 = inlined_call_operand.hbm [shape: bf16[2,8,32], index: 0, kind: input, shape index: {}]   ;;  %s889_s1 = inlined_call_operand.hbm [shape: bf16[8,32], index: 1, kind: input, shape index: {}]   ;;  %s890_s2 = inlined_call_operand.vmem [shape: f32[1,32], index: 2, kind: input, shape index: {}]   ;;  %s891_s3 = inlined_call_operand.vmem [shape: f32[1,32], index: 3, kind: input, shape index: {}]   ;;  %s892_s4 = inlined_call_operand.hbm [shape: bf16[2,8,32], index: 4, kind: output, shape index: {}]  }
   0x1   :  { %11 = vsyncpa [#allocation3 + $0x1], 0 }
   0x2   :  { %12 = vsyncpa [#allocation6], 0 }
   0x3   :  { %13 = vsyncpa [#allocation4], 0 }
   0x4   :  { %15 = vsyncpa [#allocation4 + $0x1], 0  ;;  %s662_s15 = smov 0   ;;  %s664_s16 = smov 0  }
   0x5   :  { %s666_s17 = smov 0   ;;  %s668_s18 = smov 0  }
   0x6   :  { %s670_s19 = smov 0   ;;  %s672_s20 = smov 0  }
   0x7 LB: > { %s396_s21 = sadd.s32 4294967295, %s632_s20   ;;  %s397_s22 = sadd.s32 4294967294, %s632_s20   ;;  %s632_s20 = sphi %s672_s20, %s21_s20   ;;  %s628_s19 = sphi %s670_s19, %s917_s19   ;;  %s624_s18 = sphi %s668_s18, %s916_s18   ;;  %s620_s17 = sphi %s666_s17, %s915_s17   ;;  %s616_s16 = sphi %s664_s16, %s914_s16   ;;  %s612_s15 = sphi %s662_s15, %s913_s15  }
   0x8   : > { %p55_p0 = scmp.ne.s32.totalorder %s616_s16, %s612_s15  ;;  %p696_p1 = scmp.eq.s32.totalorder %s396_s21, 0 }
   0x9   : > { %p700_p2 = scmp.eq.s32.totalorder %s396_s21, 1  ;;  %p155_p3 = scmp.eq.s32.totalorder %s397_s22, 1 }
   0xa   : > { %s897_s23 = scalar_select %p696_p1, 1, 0 }
   0xb   : > { %s898_s24 = scalar_select %p700_p2, 1, 0 }
   0xc   : > { %p706_p4 = por %p696_p1, %p55_p0  ;;  %p398_p5 = scmp.ge.s32.totalorder %s632_s20, 1 }
   0xd   : > { %p711_p6 = por %p155_p3, %p55_p0  ;;  %p162_p7 = scmp.lt.s32.totalorder %s632_s20, 3 }
   0xe   : > { %s899_s25 = scalar_select %p706_p4, 1, 0 }
   0xf   : > { %s900_s26 = scalar_select %p711_p6, 1, 0 }
  0x10   : > { %p716_p8 = pnand %p398_p5, %p162_p7  ;;  %s634_s28 = smov [#allocation5]  }
  0x11   : > { %s177_s29 = sshll.u32 %s634_s28, 4  ;;  %s33_s5 = sadd.s32 1, %s628_s19  ;;  %s178_s29 = int_to_ptr.vmem [resolvable:$true] %s177_s29 }
  0x12   : > { %s901_s27 = scalar_select %p716_p8, 1, 0 }
  0x13   : > { %p421_p10 = pneg %p716_p8  ;;  %s42_s6 = sadd.s32 1, %s620_s17 }
  0x14   : > { %p731_p12 = scmp.ge.s32.totalorder %s33_s5, 2  ;;  %s488_s10 = scalar_lea.hbm %s889_s1, 64 }
  0x15   : > { %p725_p11 = pnand %p421_p10, %p696_p1  ;;  %p489_p13 = scmp.ne.s32.totalorder %s889_s1, %s488_s10 }
  0x16   : > { %s903_s7 = scalar_select %p731_p12, 1, 0 }
  0x17   : > { %p490_p0 = pneg %p725_p11  ;;  %p495_p7 = scmp.lt.u32.totalorder %s488_s10, %s889_s1 }
  0x19   : > { %p491_p3 = pnand %p490_p0, %p489_p13 }
  0x1b   : > { %p492_p5 = pneg %p491_p3 }
  0x1d   : > { %p497_p10 = pnand %p495_p7, %p492_p5 }
  0x1f   : > { %500 = shalt.err (!%p497_p10)
}
  0x20   : > { %s501_s21 = scalar_lea.vmem %s178_s29, 64  ;;  %p509_p4 = scmp.lt.s32.totalorder %s178_s29, %s178_s29 }
  0x21   : > { %p502_p9 = scmp.ne.s32.totalorder %s178_s29, %s501_s21  ;;  %p510_p8 = scmp.lt.s32.totalorder %s501_s21, %s501_s21 }
  0x23   : > { %p504_p6 = pnand %p502_p9, %p490_p0  ;;  %p511_p2 = por %p510_p8, %p509_p4 }
  0x25   : > { %p505_p1 = pneg %p504_p6 }
  0x27   : > { %p512_p12 = pnand %p511_p2, %p505_p1 }
  0x29   : > { %515 = shalt.err (!%p512_p12)
}
  0x2a   : > { %424 = dma.hbm_to_vmem [thread:$0]  (!%p725_p11), %s889_s1, 64, %s178_s29, [#allocation6]  }
  0x2b   : > { %p904_p4 = scmp.ne.s32.totalorder %s903_s7, 0  ;;  %p49_p1 = scmp.ne.s32.totalorder %s620_s17, %s616_s16 }
  0x2c   : > { %p50_p2 = scmp.eq.s32.totalorder %s632_s20, 0  ;;  %p434_p6 = scmp.lt.s32.totalorder %s632_s20, 2 }
  0x2d   : > { %s919_s5 = smov (%p904_p4, %s33_s5), 0  ;;  %p905_p12 = scmp.ne.s32.totalorder %s898_s24, 0 }
  0x2e   : > { %s37_s30 = ssub.s32 %s628_s19, %s919_s5  ;;  %p51_p9 = por %p50_p2, %p49_p1 }
  0x2f   : > { %p40_p8 = scmp.eq.s32.totalorder %s37_s30, 0  ;;  %p763_p13 = por %p905_p12, %p49_p1 }
  0x30   : > { %s194_s9 = sand.u32 1, %s620_s17   ;;  %s402_s7 = sshll.u32 %s628_s19, 6 }
  0x31   : > { %s771_s10 = scalar_select %p40_p8, %s620_s17, %s42_s6  }
  0x32   : > { %s401_s29 = sshll.u32 %s194_s9, 2  ;;  %s777_s13 = scalar_lea.hbm %s888_s0, %s402_s7 }
  0x33   : > { %s198_s24 = scalar_lea.vmem [#allocation2], %s401_s29  ;;  %p781_p11 = pnand %p434_p6, %p51_p9 }
  0x34   : > { %s206_s14 = sshll.u32 %s198_s24, 4  ;;  %s195_s6 = scalar_lea.sflag [#allocation3], %s194_s9  ;;  %s779_s14 = int_to_ptr.vmem [resolvable:$true] %s206_s14 }
  0x35   : > { %s516_s22 = scalar_lea.hbm %s777_s13, 64  ;;  %p518_p3 = pneg %p781_p11 }
  0x36   : > { %p517_p0 = scmp.ne.s32.totalorder %s777_s13, %s516_s22  ;;  %s521_s29 = scalar_lea.hbm %s888_s0, 128 }
  0x37   : > { %p522_p10 = scmp.lt.u32.totalorder %s777_s13, %s888_s0  ;;  %p523_p4 = scmp.lt.u32.totalorder %s521_s29, %s516_s22 }
  0x38   : > { %p519_p5 = pnand %p518_p3, %p517_p0  ;;  %p525_p2 = scmp.lt.u32.totalorder %s516_s22, %s777_s13 }
  0x39   : > { %p524_p1 = por %p523_p4, %p522_p10 }
  0x3a   : > { %p520_p7 = pneg %p519_p5 }
  0x3b   : > { %p526_p6 = por %p525_p2, %p524_p1 }
  0x3d   : > { %p527_p8 = pnand %p526_p6, %p520_p7 }
  0x3f   : > { %530 = shalt.err (!%p527_p8)
}
  0x40   : > { %s531_s9 = scalar_lea.vmem %s779_s14, 64  ;;  %s635_s12 = smov [#allocation2]  }
  0x41   : > { %p532_p9 = scmp.ne.s32.totalorder %s779_s14, %s531_s9  ;;  %s536_s24 = sshll.u32 %s635_s12, 4  ;;  %s537_s24 = int_to_ptr.vmem [resolvable:$false] %s536_s24 }
  0x42   : > { %s538_s28 = scalar_lea.vmem %s537_s24, 128  ;;  %p539_p5 = scmp.lt.s32.totalorder %s779_s14, %s537_s24 }
  0x43   : > { %p534_p12 = pnand %p532_p9, %p518_p3  ;;  %p540_p10 = scmp.lt.s32.totalorder %s538_s28, %s531_s9 }
  0x45   : > { %p535_p0 = pneg %p534_p12  ;;  %p541_p4 = por %p540_p10, %p539_p5 }
  0x47   : > { %p542_p1 = pnand %p541_p4, %p535_p0 }
  0x49   : > { %545 = shalt.err (!%p542_p1)
}
  0x4a   : > { %428 = dma.hbm_to_vmem [thread:$0]  (!%p781_p11), %s777_s13, 64, %s779_s14, %s195_s6  }
  0x4b   : > { %p908_p7 = scmp.ne.s32.totalorder %s901_s27, 0 }
  0x4c   : > { %s813_s22 = sand.u32 (!%p908_p7), 1, %s616_s16   ;;  %p909_p3 = scmp.ne.s32.totalorder (!%p908_p7), %s899_s25, 0 }
  0x4d   : > { %215 = sbr.rel (%p908_p7) target bundleno = 422 (0x1a6), region = 36  ;;  %s404_s30 = sshll.u32 (!%p908_p7), %s813_s22, 2 }
  0x4e   : > { %s218_s29 = scalar_lea.sflag (!%p908_p7), [#allocation3], %s813_s22  ;;  %s221_s7 = scalar_lea.vmem (!%p908_p7), [#allocation2], %s404_s30 }
  0x54   : > { %599 = dma.done.wait (%p909_p3), %s218_s29, 64  }
  0x55   : > { %601 = vsyncadd (%p909_p3), %s218_s29, 4294967232  ;;  %p910_p11 = scmp.ne.s32.totalorder %s897_s23, 0 }
  0x57   : > { %603 = dma.done.wait (%p910_p11), [#allocation6], 64  }
  0x58   : > { %605 = vsyncadd (%p910_p11), [#allocation6], 4294967232  ;;  %v250_v0 = vld [vmem:[%s221_s7] sm:$0xf]  ;;  %v252_v1 = vld [vmem:[#allocation5] sm:$0xf] }
  0x59   : > { %v251_v2 = vunpack.c.l.bf16 %v250_v0  ;;  %v253_v3 = vunpack.c.l.bf16 %v252_v1  ;;  %vm255_vm0 = vcmask 261120   ;;  %v407_v15 = vld [vmem:[%s890_s2] ss:$0 sm:$0xff]  ;;  %s410_s14 = sshll.u32 %s624_s18, 6  ;;  %s249_s21 = scalar_lea.vmem [#allocation7], %s404_s30  ;;  %vm287_vm1 = vcmask 257024  }
  0x5a   : > { %v408_v17 = vld [vmem:[%s891_s3] ss:$0 sm:$0xff]  ;;  %s304_s6 = sshll.u32 %s249_s21, 4  ;;  %s839_s12 = scalar_lea.hbm %s892_s4, %s410_s14  ;;  %s841_s6 = int_to_ptr.vmem [resolvable:$true] %s304_s6 }
  0x5b   : > { %v254_v4 = vadd.f32 %v253_v3, %v251_v2  ;;  %s290_s24 = scalar_lea.sflag [#allocation4], %s813_s22  ;;  %s546_s28 = scalar_lea.vmem %s841_s6, 64 }
  0x5c   : > { %p547_p2 = scmp.ne.s32.totalorder %s841_s6, %s546_s28  ;;  %s636_s18 = smov [#allocation7]  }
  0x5d   : > { %v256_v5 = vsel %vm255_vm0, %v254_v4, 0.0  ;;  %s550_s30 = sshll.u32 %s636_s18, 4  ;;  %s551_s30 = int_to_ptr.vmem [resolvable:$false] %s550_s30 }
  0x5e   : > { %257 = vadd.xlane.f32.xlu0 %v256_v5  ;;  %p548_p6 = pnand %p547_p2, %p763_p13  ;;  %s552_s29 = scalar_lea.vmem %s551_s30, 128 }
  0x5f   : > { %p553_p9 = scmp.lt.s32.totalorder %s841_s6, %s551_s30  ;;  %p554_p12 = scmp.lt.s32.totalorder %s552_s29, %s546_s28 }
  0x60   : > { %p549_p8 = pneg %p548_p6 }
  0x61   : > { %p555_p0 = por %p554_p12, %p553_p9 }
  0x63   : > { %p556_p5 = pnand %p555_p0, %p549_p8 }
  0xeb   : > { %v258_v6 = vpop.xlane.xlu0 %257 }
  0xec   : > { %v260_v7 = vmul.f32 0.03125, %v258_v6 }
  0xee   : > { %v261_v8 = vsub.f32 %v254_v4, %v260_v7 }
  0xf0   : > { %v262_v9 = vmul.f32 %v261_v8, %v261_v8 }
  0xf2   : > { %v263_v10 = vsel %vm255_vm0, %v262_v9, 0.0 }
  0xf3   : > { %264 = vadd.xlane.f32.xlu0 %v263_v10 }
 0x180   : > { %v265_v11 = vpop.xlane.xlu0 %264 }
 0x181   : > { %v266_v12 = vmul.f32 0.03125, %v265_v11 }
 0x183   : > { %v267_v13 = vadd.f32 1e-12, %v266_v12 }
 0x185   : > { %486 = vrsqrt.f32 %v267_v13 }
 0x18f   : > { %v487_v14 = vpop.eup %486 }
 0x190   : > { %v269_v16 = vmul.f32 %v487_v14, %v261_v8 }
 0x192   : > { %v277_v18 = vmul.f32 %v407_v15, %v269_v16 }
 0x194   : > { %v285_v19 = vadd.f32 %v408_v17, %v277_v18 }
 0x196   : > { %v286_v20 = vpack.c.bf16 %v285_v19, %v285_v19 }
 0x198   : > { %288 = vst.msk [vmem:[%s249_s21] sm:$0xf] %vm287_vm1, %v286_v20 }
 0x199   : > { %559 = shalt.err (!%p556_p5)
}
 0x19a   : > { %s560_s22 = scalar_lea.hbm %s839_s12, 64  ;;  %s564_s25 = scalar_lea.hbm %s892_s4, 128 }
 0x19b   : > { %p561_p10 = scmp.ne.s32.totalorder %s839_s12, %s560_s22  ;;  %p565_p7 = scmp.lt.u32.totalorder %s839_s12, %s892_s4 }
 0x19c   : > { %p566_p3 = scmp.lt.u32.totalorder %s564_s25, %s560_s22  ;;  %p568_p2 = scmp.lt.u32.totalorder %s560_s22, %s839_s12 }
 0x19d   : > { %p562_p4 = pnand %p561_p10, %p763_p13 }
 0x19e   : > { %p567_p11 = por %p566_p3, %p565_p7 }
 0x19f   : > { %p563_p1 = pneg %p562_p4 }
 0x1a0   : > { %p569_p6 = por %p568_p2, %p567_p11 }
 0x1a2   : > { %p570_p8 = pnand %p569_p6, %p563_p1 }
 0x1a4   : > { %573 = shalt.err (!%p570_p8)
}
 0x1a5   : > { %419 = dma.vmem_to_hbm [thread:$0]  (%p763_p13), %s841_s6, 64, %s839_s12, %s290_s24  }
 0x1a6 PF: > { %s316_s14 = sand.u32 1, %s612_s15   ;;  %p911_p9 = scmp.ne.s32.totalorder %s900_s26, 0 }
 0x1a7   : > { %p912_p12 = scmp.ge.s32.totalorder %s632_s20, 2  ;;  %s317_s21 = scalar_lea.sflag [#allocation4], %s316_s14 }
 0x1a9   : > { %p430_p0 = pnand %p912_p12, %p911_p9 }
 0x1ab   : > { %607 = dma.done.wait (!%p430_p0), %s317_s21, 64  }
 0x1ac   : > { %609 = vsyncadd (!%p430_p0), %s317_s21, 4294967232  ;;  %s21_s20 = sadd.s32 1, %s632_s20   ;;  %s913_s15 = smov %s616_s16 }
 0x1ad   : > { %p18_p5 = scmp.ge.s32.totalorder %s21_s20, 4   ;;  %s914_s16 = smov %s620_s17 }
 0x1ae   : > { %s915_s17 = smov %s771_s10  ;;  %s916_s18 = smov %s628_s19 }
 0x1af   : > { %s917_s19 = smov %s919_s5  ;;  %20 = sbr.rel (!%p18_p5) target bundleno = 7 (0x7), region = 86 }
 0x1b6   :  { %322 = vsyncpa [#allocation3], 1 }
 0x1b7   :  { %324 = vsyncpa [#allocation3 + $0x1], 1 }
 0x1b8   :  { %325 = vsyncpa [#allocation6], 1 }
 0x1b9   :  { %326 = vsyncpa [#allocation4], 1 }
 0x1ba   :  { %328 = vsyncpa [#allocation4 + $0x1], 1 }

</bundles_post_ra>
